<compile_context>
chip_gen: v5e
topology: v5e:2x2
jax: 0.10.0
libtpu: 0.0.40
codegen_flags: <defaults>
</compile_context>

<pallas_src>
import functools

import jax
import jax.numpy as jnp
from jax.experimental import pallas as pl
from jax.experimental.pallas import tpu as pltpu

_LANE = 128   # vreg lane width
_SUB = 8      # vreg sublane count


def _round_up(n, m):
    return ((n + m - 1) // m) * m


def mlp_kernel(x_ref, w1_ref, b1_ref, w2_ref, b2_ref, w3_ref, b3_ref,
               w4_ref, b4_ref, out_ref, *, num_class, compute_dtype):
    """One batch tile: 4 x (MXU matmul + bias + LeakyReLU(0.9)) + log-softmax."""

    def layer(h, w_ref, b_ref):
        # MXU matmul in compute_dtype with f32 accumulation.
        y = jnp.dot(h.astype(compute_dtype), w_ref[...],
                    preferred_element_type=jnp.float32)
        y = y + b_ref[...]                      # bias in f32 (VPU)
        return jnp.where(y >= 0, y, 0.9 * y)    # LeakyReLU(0.9) in f32

    h = x_ref[...]
    h = layer(h, w1_ref, b1_ref)
    h = layer(h, w2_ref, b2_ref)
    h = layer(h, w3_ref, b3_ref)
    logits = layer(h, w4_ref, b4_ref)

    # Mask padded class lanes before the cross-lane max/sum reductions so the
    # log-softmax only sees the real num_class columns.
    col = jax.lax.broadcasted_iota(jnp.int32, logits.shape, 1)
    logits = jnp.where(col < num_class, logits, jnp.float32(-1e30))

    m = jnp.max(logits, axis=1, keepdims=True)
    shifted = logits - m
    lse = jnp.log(jnp.sum(jnp.exp(shifted), axis=1, keepdims=True))
    out_ref[...] = shifted - lse


def mlp_forward(x, params, *, compute_dtype=jnp.float32, tile_b=128):
    """x: (B, max_len, input_size) float32. Returns (B, num_class) log-probs."""
    B = x.shape[0]
    x_flat = x.reshape(B, -1).astype(jnp.float32)   # == torch x.view(B, -1)
    f_in = x_flat.shape[1]

    (w1, b1), (w2, b2), (w3, b3), (w4, b4) = params
    num_class = w4.shape[1]

    # Lane-dense padded feature dims (multiples of 128).
    F = _round_up(f_in, _LANE)
    H1 = _round_up(w1.shape[1], _LANE)
    H2 = _round_up(w2.shape[1], _LANE)
    H3 = _round_up(w3.shape[1], _LANE)
    C = _round_up(num_class, _LANE)

    # Batch tile: multiple of 8 sublanes, capped at tile_b.
    TILE_B = min(_round_up(B, _SUB), _round_up(tile_b, _SUB))
    B_pad = _round_up(B, TILE_B)

    def pad2(a, rows, cols, dtype):
        out = jnp.zeros((rows, cols), dtype)
        return out.at[:a.shape[0], :a.shape[1]].set(a.astype(dtype))

    # Inputs/weights in compute_dtype (bf16 halves DMA bytes on v6e/v7x),
    # biases kept in f32 for the f32 elementwise tail.
    xp = pad2(x_flat, B_pad, F, compute_dtype)
    w1p, b1p = pad2(w1, F, H1, compute_dtype), pad2(b1, 1, H1, jnp.float32)
    w2p, b2p = pad2(w2, H1, H2, compute_dtype), pad2(b2, 1, H2, jnp.float32)
    w3p, b3p = pad2(w3, H2, H3, compute_dtype), pad2(b3, 1, H3, jnp.float32)
    w4p, b4p = pad2(w4, H3, C, compute_dtype), pad2(b4, 1, C, jnp.float32)

    grid = (B_pad // TILE_B,)

    def resident(shape):
        # Constant block index -> stays VMEM-resident across all grid steps.
        return pl.BlockSpec(shape, lambda i: (0, 0))

    kernel = functools.partial(mlp_kernel, num_class=num_class,
                               compute_dtype=compute_dtype)

    # NOTE: if input_size * max_len gets large enough that W1 no longer fits
    # VMEM (esp. v7x's 64 MiB), add a trailing "arbitrary" K-tiling axis for
    # the first matmul with a VMEM f32 accumulator (pl.when init/finalize).
    out_padded = pl.pallas_call(
        kernel,
        out_shape=jax.ShapeDtypeStruct((B_pad, C), jnp.float32),
        grid=grid,
        in_specs=[
            pl.BlockSpec((TILE_B, F), lambda i: (i, 0)),   # x tile (pipelined)
            resident((F, H1)), resident((1, H1)),
            resident((H1, H2)), resident((1, H2)),
            resident((H2, H3)), resident((1, H3)),
            resident((H3, C)), resident((1, C)),
        ],
        out_specs=pl.BlockSpec((TILE_B, C), lambda i: (i, 0)),
        compiler_params=pltpu.CompilerParams(
            dimension_semantics=("parallel",)),
    )(xp, w1p, b1p, w2p, b2p, w3p, b3p, w4p, b4p)

    return out_padded[:B, :num_class]


def init_params(key, input_size, latent_size, num_class, max_len):
    """nn.Linear-style init (uniform +/- 1/sqrt(fan_in)); W stored (fan_in, fan_out)."""
    dims = [
        (input_size * max_len, latent_size * 4),
        (latent_size * 4, latent_size * 2),
        (latent_size * 2, latent_size),
        (latent_size, num_class),
    ]
    params = []
    for fan_in, fan_out in dims:
        key, kw, kb = jax.random.split(key, 3)
        bound = 1.0 / jnp.sqrt(fan_in)
        w = jax.random.uniform(kw, (fan_in, fan_out), jnp.float32, -bound, bound)
        b = jax.random.uniform(kb, (1, fan_out), jnp.float32, -bound, bound)
        params.append((w, b))
    return params


def mlp_reference(x, params):
    """Pure-JAX reference for correctness checking."""
    h = x.reshape(x.shape[0], -1).astype(jnp.float32)
    for w, b in params:
        h = h @ w + b
        h = jnp.where(h >= 0, h, 0.9 * h)
    return jax.nn.log_softmax(h, axis=1)


if __name__ == "__main__":
    # Small shapes consistent with the module's constructor.
    input_size, latent_size, num_class, max_len = 4, 8, 4, 8
    B = 2

    key = jax.random.PRNGKey(0)
    key, kx = jax.random.split(key)
    x = jax.random.normal(kx, (B, max_len, input_size), jnp.float32)
    params = init_params(key, input_size, latent_size, num_class, max_len)

    ref = mlp_reference(x, params)

    # f32 matmul path (v5e-safe): tight tolerance.
    out = jax.block_until_ready(mlp_forward(x, params))
    assert out.shape == (B, num_class)
    assert jnp.allclose(out, ref, atol=1e-5, rtol=1e-5), (out, ref)

    # bf16 matmul path (v6e/v7x MXU): f32 accumulation, looser tolerance.
    out_bf16 = jax.block_until_ready(
        mlp_forward(x, params, compute_dtype=jnp.bfloat16))
    assert out_bf16.shape == (B, num_class)
    assert jnp.allclose(out_bf16, ref, atol=1e-1, rtol=1e-1), (out_bf16, ref)

    print("KERNEL_OK")
</pallas_src>

<mosaic_0001>
module attributes {stable_mosaic.version = 11 : i64} {
  func.func @mlp_kernel(%arg0: i32, %arg1: memref<8x128xf32, #tpu.memory_space<vmem>>, %arg2: memref<128x128xf32, #tpu.memory_space<vmem>>, %arg3: memref<1x128xf32, #tpu.memory_space<vmem>>, %arg4: memref<128x128xf32, #tpu.memory_space<vmem>>, %arg5: memref<1x128xf32, #tpu.memory_space<vmem>>, %arg6: memref<128x128xf32, #tpu.memory_space<vmem>>, %arg7: memref<1x128xf32, #tpu.memory_space<vmem>>, %arg8: memref<128x128xf32, #tpu.memory_space<vmem>>, %arg9: memref<1x128xf32, #tpu.memory_space<vmem>>, %arg10: memref<8x128xf32, #tpu.memory_space<vmem>>) attributes {dimension_semantics = [#tpu.dimension_semantics<parallel>], iteration_bounds = array<i64: 1>, scalar_prefetch = 0 : i64, scratch_operands = 0 : i64, tpu.core_type = #tpu.core_type<tc>, window_params = [{transform_indices = @transform_0, window_bounds = array<i64: 8, 128>}, {pipeline_mode = #tpu.pipeline_mode<synchronous>, transform_indices = @transform_1, window_bounds = array<i64: 128, 128>}, {pipeline_mode = #tpu.pipeline_mode<synchronous>, transform_indices = @transform_2, window_bounds = array<i64: 1, 128>}, {pipeline_mode = #tpu.pipeline_mode<synchronous>, transform_indices = @transform_3, window_bounds = array<i64: 128, 128>}, {pipeline_mode = #tpu.pipeline_mode<synchronous>, transform_indices = @transform_4, window_bounds = array<i64: 1, 128>}, {pipeline_mode = #tpu.pipeline_mode<synchronous>, transform_indices = @transform_5, window_bounds = array<i64: 128, 128>}, {pipeline_mode = #tpu.pipeline_mode<synchronous>, transform_indices = @transform_6, window_bounds = array<i64: 1, 128>}, {pipeline_mode = #tpu.pipeline_mode<synchronous>, transform_indices = @transform_7, window_bounds = array<i64: 128, 128>}, {pipeline_mode = #tpu.pipeline_mode<synchronous>, transform_indices = @transform_8, window_bounds = array<i64: 1, 128>}, {transform_indices = @transform_9, window_bounds = array<i64: 8, 128>}]} {
    %c0 = arith.constant 0 : index
    %c0_0 = arith.constant 0 : index
    %0 = vector.load %arg1[%c0, %c0_0] : memref<8x128xf32, #tpu.memory_space<vmem>>, vector<8x128xf32>
    %c0_1 = arith.constant 0 : index
    %c0_2 = arith.constant 0 : index
    %1 = vector.load %arg2[%c0_1, %c0_2] : memref<128x128xf32, #tpu.memory_space<vmem>>, vector<128x128xf32>
    %cst = arith.constant dense<0.000000e+00> : vector<8x128xf32>
    %2 = tpu.matmul %0, %1, %cst {dimension_numbers = #tpu.dot_dimension_numbers<[1], [0], [0], [1], [0, 0, 1, 1], [], []>} : vector<8x128xf32>, vector<128x128xf32>, vector<8x128xf32> -> vector<8x128xf32>
    %c0_3 = arith.constant 0 : index
    %c0_4 = arith.constant 0 : index
    %3 = vector.load %arg3[%c0_3, %c0_4] : memref<1x128xf32, #tpu.memory_space<vmem>>, vector<1x128xf32>
    %4 = vector.broadcast %3 : vector<1x128xf32> to vector<8x128xf32>
    %5 = arith.addf %2, %4 : vector<8x128xf32>
    %cst_5 = arith.constant 0.000000e+00 : f32
    %6 = vector.broadcast %cst_5 : f32 to vector<8x128xf32>
    %7 = arith.cmpf oge, %5, %6 : vector<8x128xf32>
    %cst_6 = arith.constant 0.899999976 : f32
    %8 = vector.broadcast %cst_6 : f32 to vector<8x128xf32>
    %9 = arith.mulf %8, %5 : vector<8x128xf32>
    %10 = arith.select %7, %5, %9 : vector<8x128xi1>, vector<8x128xf32>
    %c0_7 = arith.constant 0 : index
    %c0_8 = arith.constant 0 : index
    %11 = vector.load %arg4[%c0_7, %c0_8] : memref<128x128xf32, #tpu.memory_space<vmem>>, vector<128x128xf32>
    %cst_9 = arith.constant dense<0.000000e+00> : vector<8x128xf32>
    %12 = tpu.matmul %10, %11, %cst_9 {dimension_numbers = #tpu.dot_dimension_numbers<[1], [0], [0], [1], [0, 0, 1, 1], [], []>} : vector<8x128xf32>, vector<128x128xf32>, vector<8x128xf32> -> vector<8x128xf32>
    %c0_10 = arith.constant 0 : index
    %c0_11 = arith.constant 0 : index
    %13 = vector.load %arg5[%c0_10, %c0_11] : memref<1x128xf32, #tpu.memory_space<vmem>>, vector<1x128xf32>
    %14 = vector.broadcast %13 : vector<1x128xf32> to vector<8x128xf32>
    %15 = arith.addf %12, %14 : vector<8x128xf32>
    %cst_12 = arith.constant 0.000000e+00 : f32
    %16 = vector.broadcast %cst_12 : f32 to vector<8x128xf32>
    %17 = arith.cmpf oge, %15, %16 : vector<8x128xf32>
    %cst_13 = arith.constant 0.899999976 : f32
    %18 = vector.broadcast %cst_13 : f32 to vector<8x128xf32>
    %19 = arith.mulf %18, %15 : vector<8x128xf32>
    %20 = arith.select %17, %15, %19 : vector<8x128xi1>, vector<8x128xf32>
    %c0_14 = arith.constant 0 : index
    %c0_15 = arith.constant 0 : index
    %21 = vector.load %arg6[%c0_14, %c0_15] : memref<128x128xf32, #tpu.memory_space<vmem>>, vector<128x128xf32>
    %cst_16 = arith.constant dense<0.000000e+00> : vector<8x128xf32>
    %22 = tpu.matmul %20, %21, %cst_16 {dimension_numbers = #tpu.dot_dimension_numbers<[1], [0], [0], [1], [0, 0, 1, 1], [], []>} : vector<8x128xf32>, vector<128x128xf32>, vector<8x128xf32> -> vector<8x128xf32>
    %c0_17 = arith.constant 0 : index
    %c0_18 = arith.constant 0 : index
    %23 = vector.load %arg7[%c0_17, %c0_18] : memref<1x128xf32, #tpu.memory_space<vmem>>, vector<1x128xf32>
    %24 = vector.broadcast %23 : vector<1x128xf32> to vector<8x128xf32>
    %25 = arith.addf %22, %24 : vector<8x128xf32>
    %cst_19 = arith.constant 0.000000e+00 : f32
    %26 = vector.broadcast %cst_19 : f32 to vector<8x128xf32>
    %27 = arith.cmpf oge, %25, %26 : vector<8x128xf32>
    %cst_20 = arith.constant 0.899999976 : f32
    %28 = vector.broadcast %cst_20 : f32 to vector<8x128xf32>
    %29 = arith.mulf %28, %25 : vector<8x128xf32>
    %30 = arith.select %27, %25, %29 : vector<8x128xi1>, vector<8x128xf32>
    %c0_21 = arith.constant 0 : index
    %c0_22 = arith.constant 0 : index
    %31 = vector.load %arg8[%c0_21, %c0_22] : memref<128x128xf32, #tpu.memory_space<vmem>>, vector<128x128xf32>
    %cst_23 = arith.constant dense<0.000000e+00> : vector<8x128xf32>
    %32 = tpu.matmul %30, %31, %cst_23 {dimension_numbers = #tpu.dot_dimension_numbers<[1], [0], [0], [1], [0, 0, 1, 1], [], []>} : vector<8x128xf32>, vector<128x128xf32>, vector<8x128xf32> -> vector<8x128xf32>
    %c0_24 = arith.constant 0 : index
    %c0_25 = arith.constant 0 : index
    %33 = vector.load %arg9[%c0_24, %c0_25] : memref<1x128xf32, #tpu.memory_space<vmem>>, vector<1x128xf32>
    %34 = vector.broadcast %33 : vector<1x128xf32> to vector<8x128xf32>
    %35 = arith.addf %32, %34 : vector<8x128xf32>
    %cst_26 = arith.constant 0.000000e+00 : f32
    %36 = vector.broadcast %cst_26 : f32 to vector<8x128xf32>
    %37 = arith.cmpf oge, %35, %36 : vector<8x128xf32>
    %cst_27 = arith.constant 0.899999976 : f32
    %38 = vector.broadcast %cst_27 : f32 to vector<8x128xf32>
    %39 = arith.mulf %38, %35 : vector<8x128xf32>
    %40 = arith.select %37, %35, %39 : vector<8x128xi1>, vector<8x128xf32>
    %41 = tpu.iota {dimensions = array<i32: 1>} : vector<8x128xi32>
    %c4_i32 = arith.constant 4 : i32
    %42 = vector.broadcast %c4_i32 : i32 to vector<8x128xi32>
    %43 = arith.cmpi slt, %41, %42 : vector<8x128xi32>
    %cst_28 = arith.constant -1.000000e+30 : f32
    %44 = vector.broadcast %cst_28 : f32 to vector<8x128xf32>
    %45 = arith.select %43, %40, %44 : vector<8x128xi1>, vector<8x128xf32>
    %cst_29 = arith.constant dense<0xFF800000> : vector<8xf32>
    %46 = vector.multi_reduction <maximumf>, %45, %cst_29 [1] : vector<8x128xf32> to vector<8xf32>
    %47 = vector.shape_cast %46 : vector<8xf32> to vector<8x1xf32>
    %48 = vector.broadcast %47 : vector<8x1xf32> to vector<8x128xf32>
    %49 = arith.subf %45, %48 : vector<8x128xf32>
    %50 = math.exp %49 : vector<8x128xf32>
    %cst_30 = arith.constant dense<0.000000e+00> : vector<8xf32>
    %51 = vector.multi_reduction <add>, %50, %cst_30 [1] : vector<8x128xf32> to vector<8xf32>
    %52 = vector.shape_cast %51 : vector<8xf32> to vector<8x1xf32>
    %53 = math.log %52 : vector<8x1xf32>
    %54 = vector.broadcast %53 : vector<8x1xf32> to vector<8x128xf32>
    %55 = arith.subf %49, %54 : vector<8x128xf32>
    %c0_31 = arith.constant 0 : index
    %c0_32 = arith.constant 0 : index
    %56 = vector.load %arg10[%c0_31, %c0_32] : memref<8x128xf32, #tpu.memory_space<vmem>>, vector<8x128xf32>
    tpu.vector_store %arg10[%c0_31, %c0_32], %55 {strides = array<i32>} : memref<8x128xf32, #tpu.memory_space<vmem>>, vector<8x128xf32>,
    return
  }
  func.func @transform_0(%arg0: i32) -> (i32, i32) {
    %c0_i32 = arith.constant 0 : i32
    %c0_i32_0 = arith.constant 0 : i32
    return %arg0, %c0_i32 : i32, i32
  }
  func.func @transform_1(%arg0: i32) -> (i32, i32) {
    %c0_i32 = arith.constant 0 : i32
    %c0_i32_0 = arith.constant 0 : i32
    %c0_i32_1 = arith.constant 0 : i32
    return %c0_i32, %c0_i32_0 : i32, i32
  }
  func.func @transform_2(%arg0: i32) -> (i32, i32) {
    %c0_i32 = arith.constant 0 : i32
    %c0_i32_0 = arith.constant 0 : i32
    %c0_i32_1 = arith.constant 0 : i32
    return %c0_i32, %c0_i32_0 : i32, i32
  }
  func.func @transform_3(%arg0: i32) -> (i32, i32) {
    %c0_i32 = arith.constant 0 : i32
    %c0_i32_0 = arith.constant 0 : i32
    %c0_i32_1 = arith.constant 0 : i32
    return %c0_i32, %c0_i32_0 : i32, i32
  }
  func.func @transform_4(%arg0: i32) -> (i32, i32) {
    %c0_i32 = arith.constant 0 : i32
    %c0_i32_0 = arith.constant 0 : i32
    %c0_i32_1 = arith.constant 0 : i32
    return %c0_i32, %c0_i32_0 : i32, i32
  }
  func.func @transform_5(%arg0: i32) -> (i32, i32) {
    %c0_i32 = arith.constant 0 : i32
    %c0_i32_0 = arith.constant 0 : i32
    %c0_i32_1 = arith.constant 0 : i32
    return %c0_i32, %c0_i32_0 : i32, i32
  }
  func.func @transform_6(%arg0: i32) -> (i32, i32) {
    %c0_i32 = arith.constant 0 : i32
    %c0_i32_0 = arith.constant 0 : i32
    %c0_i32_1 = arith.constant 0 : i32
    return %c0_i32, %c0_i32_0 : i32, i32
  }
  func.func @transform_7(%arg0: i32) -> (i32, i32) {
    %c0_i32 = arith.constant 0 : i32
    %c0_i32_0 = arith.constant 0 : i32
    %c0_i32_1 = arith.constant 0 : i32
    return %c0_i32, %c0_i32_0 : i32, i32
  }
  func.func @transform_8(%arg0: i32) -> (i32, i32) {
    %c0_i32 = arith.constant 0 : i32
    %c0_i32_0 = arith.constant 0 : i32
    %c0_i32_1 = arith.constant 0 : i32
    return %c0_i32, %c0_i32_0 : i32, i32
  }
  func.func @transform_9(%arg0: i32) -> (i32, i32) {
    %c0_i32 = arith.constant 0 : i32
    %c0_i32_0 = arith.constant 0 : i32
    return %arg0, %c0_i32 : i32, i32
  }
}

</mosaic_0001>

<bundles_post_ra>
// kernel: tpu_custom_call.1
= control target key start
LH: loop header
LB: loop body
LE: loop exit
PB: predicated region body
PF: predicated region fallthrough
CT: control target
= control target key end

     0   :  { %14 = vsyncpa [#allocation3], 0  ;;  %s572_s0 = inlined_call_operand.hbm [shape: f32[8,128], index: 0, kind: input, shape index: {}]   ;;  %s573_s1 = inlined_call_operand.hbm [shape: f32[128,128], index: 1, kind: input, shape index: {}]   ;;  %s574_s2 = inlined_call_operand.vmem [shape: f32[1,128], index: 2, kind: input, shape index: {}]   ;;  %s575_s3 = inlined_call_operand.hbm [shape: f32[128,128], index: 3, kind: input, shape index: {}]   ;;  %s576_s4 = inlined_call_operand.vmem [shape: f32[1,128], index: 4, kind: input, shape index: {}]   ;;  %s577_s5 = inlined_call_operand.hbm [shape: f32[128,128], index: 5, kind: input, shape index: {}]   ;;  %s578_s6 = inlined_call_operand.vmem [shape: f32[1,128], index: 6, kind: input, shape index: {}]   ;;  %s579_s7 = inlined_call_operand.hbm [shape: f32[128,128], index: 7, kind: input, shape index: {}]   ;;  %s580_s8 = inlined_call_operand.vmem [shape: f32[1,128], index: 8, kind: input, shape index: {}]   ;;  %s581_s9 = inlined_call_operand.hbm [shape: f32[8,128], index: 9, kind: output, shape index: {}]  }
   0x1   :  { %15 = vsyncpa [#allocation6], 0 }
   0x2   :  { %16 = vsyncpa [#allocation9], 0  ;;  %s33_s11 = sshll.u32 %s573_s1, 4  ;;  %s34_s11 = int_to_ptr.hbm [resolvable:$true] %s33_s11 }
   0x3   :  { %17 = vsyncpa [#allocation4], 0  ;;  %s484_s12 = smov [#allocation5]   ;;  %s63_s16 = sshll.u32 %s577_s5, 4  ;;  %s64_s16 = int_to_ptr.hbm [resolvable:$true] %s63_s16 }
   0x4   :  { %s35_s13 = sshll.u32 %s484_s12, 4  ;;  %s485_s17 = smov 128   ;;  %s36_s13 = int_to_ptr.vmem [resolvable:$true] %s35_s13 }
   0x5   :  { %s486_s18 = smov 8   ;;  %s487_s19 = smov [#allocation8]  }
   0x6   :  { %41 = dma.hbm_to_vmem [thread:$0]  %s34_s11, 2048, %s36_s13, [#allocation6], %s485_s17, %s485_s17, %s486_s18  }
   0x7   :  { %s65_s20 = sshll.u32 %s487_s19, 4  ;;  %s23_s23 = sshll.u32 %s572_s0, 4  ;;  %s66_s20 = int_to_ptr.vmem [resolvable:$true] %s65_s20  ;;  %s24_s23 = int_to_ptr.hbm [resolvable:$true] %s23_s23 }
   0x8   :  { %71 = dma.hbm_to_vmem [thread:$0]  %s64_s16, 2048, %s66_s20, [#allocation9], %s485_s17, %s485_s17, %s486_s18  }
   0x9   :  { %s48_s25 = sshll.u32 %s575_s3, 4  ;;  %s488_s26 = smov [#allocation2]   ;;  %s49_s25 = int_to_ptr.hbm [resolvable:$true] %s48_s25 }
   0xa   :  { %s25_s27 = sshll.u32 %s488_s26, 4  ;;  %s489_s5 = smov [#allocation7]   ;;  %s26_s27 = int_to_ptr.vmem [resolvable:$true] %s25_s27 }
   0xb   :  { %28 = dma.hbm_to_vmem [thread:$0]  %s24_s23, 128, %s26_s27, [#allocation3]  }
   0xc   :  { %s50_s28 = sshll.u32 %s489_s5, 4  ;;  %s78_s10 = sshll.u32 %s579_s7, 4  ;;  %s51_s28 = int_to_ptr.vmem [resolvable:$true] %s50_s28  ;;  %s79_s10 = int_to_ptr.hbm [resolvable:$true] %s78_s10 }
   0xd   :  { %56 = dma.hbm_to_vmem [thread:$0]  %s49_s25, 2048, %s51_s28, [#allocation6], %s485_s17, %s485_s17, %s486_s18  }
   0xe   :  { %s490_s0 = smov [#allocation10]  }
   0xf   :  { %s80_s11 = sshll.u32 %s490_s0, 4  ;;  %s81_s11 = int_to_ptr.vmem [resolvable:$true] %s80_s11 }
  0x10   :  { %86 = dma.hbm_to_vmem [thread:$0]  %s79_s10, 2048, %s81_s11, [#allocation9], %s485_s17, %s485_s17, %s486_s18  }
  0x11   :  { %476 = dma.done.wait [#allocation3], 128  }
  0x12   :  { %477 = vsyncadd [#allocation3], 4294967168 }
  0x13   :  { %478 = dma.done.wait [#allocation6], 4096  }
  0x14   :  { %479 = vsyncadd [#allocation6], 4294963200 }
  0x15   :  { %480 = dma.done.wait [#allocation9], 4096  }
  0x16   :  { %481 = vsyncadd [#allocation9], 4294963200  ;;  %v125_v0 = vld [vmem:[#allocation5 + $0x78] sm:$0xff]  ;;  %v124_v1 = vld [vmem:[#allocation5 + $0x70] sm:$0xff]  ;;  %s304_s18 = sshll.u32 %s581_s9, 4  ;;  %s305_s18 = int_to_ptr.hbm [resolvable:$true] %s304_s18 }
  0x17   :  { %130 = vmatpush.msra.mxu0 %v125_v0  ;;  %v123_v2 = vld [vmem:[#allocation5 + $0x68] sm:$0xff]  ;;  %v122_v3 = vld [vmem:[#allocation5 + $0x60] sm:$0xff]  ;;  %v168_v4 = vld [vmem:[#allocation7 + $0x78] sm:$0xff] }
  0x18   :  { %v121_v5 = vld [vmem:[#allocation5 + $0x58] sm:$0xff]  ;;  %173 = vmatpush.msra.mxu1 %v168_v4  ;;  %v167_v6 = vld [vmem:[#allocation7 + $0x70] sm:$0xff]  ;;  %v166_v7 = vld [vmem:[#allocation7 + $0x68] sm:$0xff] }
  0x19   :  { %131 = vmatpush.msra.mxu0 %v124_v1  ;;  %v120_v8 = vld [vmem:[#allocation5 + $0x50] sm:$0xff]  ;;  %v165_v9 = vld [vmem:[#allocation7 + $0x60] sm:$0xff]  ;;  %v119_v10 = vld [vmem:[#allocation5 + $0x48] sm:$0xff] }
  0x1a   :  { %174 = vmatpush.msra.mxu1 %v167_v6  ;;  %v164_v11 = vld [vmem:[#allocation7 + $0x58] sm:$0xff]  ;;  %v118_v12 = vld [vmem:[#allocation5 + $0x40] sm:$0xff]  ;;  %v163_v13 = vld [vmem:[#allocation7 + $0x50] sm:$0xff] }
  0x1b   :  { %132 = vmatpush.msra.mxu0 %v123_v2  ;;  %v117_v14 = vld [vmem:[#allocation5 + $0x38] sm:$0xff]  ;;  %v162_v15 = vld [vmem:[#allocation7 + $0x48] sm:$0xff]  ;;  %v116_v16 = vld [vmem:[#allocation5 + $0x30] sm:$0xff] }
  0x1c   :  { %175 = vmatpush.msra.mxu1 %v166_v7  ;;  %v161_v17 = vld [vmem:[#allocation7 + $0x40] sm:$0xff]  ;;  %v115_v18 = vld [vmem:[#allocation5 + $0x28] sm:$0xff]  ;;  %v160_v19 = vld [vmem:[#allocation7 + $0x38] sm:$0xff] }
  0x1d   :  { %133 = vmatpush.msra.mxu0 %v122_v3  ;;  %v114_v20 = vld [vmem:[#allocation5 + $0x20] sm:$0xff]  ;;  %v159_v21 = vld [vmem:[#allocation7 + $0x30] sm:$0xff]  ;;  %v113_v22 = vld [vmem:[#allocation5 + $0x18] sm:$0xff] }
  0x1e   :  { %176 = vmatpush.msra.mxu1 %v165_v9  ;;  %v158_v23 = vld [vmem:[#allocation7 + $0x28] sm:$0xff]  ;;  %v112_v24 = vld [vmem:[#allocation5 + $0x10] sm:$0xff]  ;;  %v157_v25 = vld [vmem:[#allocation7 + $0x20] sm:$0xff] }
  0x1f   :  { %134 = vmatpush.msra.mxu0 %v121_v5  ;;  %v111_v26 = vld [vmem:[#allocation5 + $0x8] sm:$0xff]  ;;  %v156_v27 = vld [vmem:[#allocation7 + $0x18] sm:$0xff]  ;;  %v110_v28 = vld [vmem:[#allocation5] sm:$0xff] }
  0x20   :  { %177 = vmatpush.msra.mxu1 %v164_v11  ;;  %v109_v29 = vld [vmem:[#allocation2] sm:$0xff]  ;;  %v155_v30 = vld [vmem:[#allocation7 + $0x10] sm:$0xff]  ;;  %v154_v31 = vld [vmem:[#allocation7 + $0x8] sm:$0xff] }
  0x21   :  { %135 = vmatpush.msra.mxu0 %v120_v8  ;;  %v153_v32 = vld [vmem:[#allocation7] sm:$0xff]  ;;  %v211_v33 = vld [vmem:[#allocation8 + $0x78] sm:$0xff]  ;;  %v210_v34 = vld [vmem:[#allocation8 + $0x70] sm:$0xff] }
  0x22   :  { %178 = vmatpush.msra.mxu1 %v163_v13  ;;  %216 = vmatpush.msra.mxu2 %v211_v33  ;;  %v209_v35 = vld [vmem:[#allocation8 + $0x68] sm:$0xff]  ;;  %v208_v36 = vld [vmem:[#allocation8 + $0x60] sm:$0xff]  ;;  %v207_v37 = vld [vmem:[#allocation8 + $0x58] sm:$0xff] }
  0x23   :  { %136 = vmatpush.msra.mxu0 %v119_v10  ;;  %v206_v38 = vld [vmem:[#allocation8 + $0x50] sm:$0xff]  ;;  %v205_v39 = vld [vmem:[#allocation8 + $0x48] sm:$0xff]  ;;  %v204_v40 = vld [vmem:[#allocation8 + $0x40] sm:$0xff] }
  0x24   :  { %179 = vmatpush.msra.mxu1 %v162_v15  ;;  %217 = vmatpush.msra.mxu2 %v210_v34  ;;  %v203_v41 = vld [vmem:[#allocation8 + $0x38] sm:$0xff]  ;;  %v202_v42 = vld [vmem:[#allocation8 + $0x30] sm:$0xff]  ;;  %v201_v43 = vld [vmem:[#allocation8 + $0x28] sm:$0xff] }
  0x25   :  { %137 = vmatpush.msra.mxu0 %v118_v12  ;;  %v200_v44 = vld [vmem:[#allocation8 + $0x20] sm:$0xff]  ;;  %v199_v45 = vld [vmem:[#allocation8 + $0x18] sm:$0xff]  ;;  %v198_v51 = vld [vmem:[#allocation8 + $0x10] sm:$0xff] }
  0x26   :  { %180 = vmatpush.msra.mxu1 %v161_v17  ;;  %218 = vmatpush.msra.mxu2 %v209_v35  ;;  %v324_v46 = vld [vmem:[%s574_s2] ss:$0 sm:$0xff]  ;;  %v197_v52 = vld [vmem:[#allocation8 + $0x8] sm:$0xff]  ;;  %v196_v53 = vld [vmem:[#allocation8] sm:$0xff] }
  0x27   :  { %138 = vmatpush.msra.mxu0 %v117_v14  ;;  %v254_v54 = vld [vmem:[#allocation10 + $0x78] sm:$0xff]  ;;  %v253_v55 = vld [vmem:[#allocation10 + $0x70] sm:$0xff]  ;;  %v252_v56 = vld [vmem:[#allocation10 + $0x68] sm:$0xff] }
  0x28   :  { %181 = vmatpush.msra.mxu1 %v160_v19  ;;  %219 = vmatpush.msra.mxu2 %v208_v36  ;;  %v251_v57 = vld [vmem:[#allocation10 + $0x60] sm:$0xff]  ;;  %v250_v58 = vld [vmem:[#allocation10 + $0x58] sm:$0xff]  ;;  %v249_v59 = vld [vmem:[#allocation10 + $0x50] sm:$0xff] }
  0x29   :  { %139 = vmatpush.msra.mxu0 %v116_v16  ;;  %259 = vmatpush.msra.mxu3 %v254_v54  ;;  %v248_v60 = vld [vmem:[#allocation10 + $0x48] sm:$0xff]  ;;  %v247_v61 = vld [vmem:[#allocation10 + $0x40] sm:$0xff]  ;;  %v246_v62 = vld [vmem:[#allocation10 + $0x38] sm:$0xff]  ;;  %v282_v16 = vlaneseq }
  0x2a   :  { %182 = vmatpush.msra.mxu1 %v159_v21  ;;  %220 = vmatpush.msra.mxu2 %v207_v37  ;;  %v245_v63 = vld [vmem:[#allocation10 + $0x30] sm:$0xff]  ;;  %v244_v0 = vld [vmem:[#allocation10 + $0x28] sm:$0xff]  ;;  %v243_v1 = vld [vmem:[#allocation10 + $0x20] sm:$0xff] }
  0x2b   :  { %140 = vmatpush.msra.mxu0 %v115_v18  ;;  %260 = vmatpush.msra.mxu3 %v253_v55  ;;  %v242_v2 = vld [vmem:[#allocation10 + $0x18] sm:$0xff]  ;;  %v241_v8 = vld [vmem:[#allocation10 + $0x10] sm:$0xff]  ;;  %v240_v9 = vld [vmem:[#allocation10 + $0x8] sm:$0xff]  ;;  %v283_v18 = vand.u32 127, %v282_v16 }
  0x2c   :  { %183 = vmatpush.msra.mxu1 %v158_v23  ;;  %221 = vmatpush.msra.mxu2 %v206_v38  ;;  %v325_v3 = vld [vmem:[%s576_s4] ss:$0 sm:$0xff]  ;;  %v239_v10 = vld [vmem:[#allocation10] sm:$0xff] }
  0x2d   :  { %141 = vmatpush.msra.mxu0 %v114_v20  ;;  %261 = vmatpush.msra.mxu3 %v252_v56  ;;  %v326_v11 = vld [vmem:[%s578_s6] ss:$0 sm:$0xff]  ;;  %vm284_vm4 = vcmp.lt.s32.totalorder %v283_v18, 4  ;;  %s491_s6 = smov [#allocation11]  }
  0x2e   :  { %184 = vmatpush.msra.mxu1 %v157_v25  ;;  %222 = vmatpush.msra.mxu2 %v205_v39  ;;  %v327_v17 = vld [vmem:[%s580_s8] ss:$0 sm:$0xff]  ;;  %s302_s8 = sshll.u32 %s491_s6, 4  ;;  %s303_s8 = int_to_ptr.vmem [resolvable:$true] %s302_s8 }
  0x2f   :  { %142 = vmatpush.msra.mxu0 %v113_v22  ;;  %262 = vmatpush.msra.mxu3 %v251_v57 }
  0x30   :  { %185 = vmatpush.msra.mxu1 %v156_v27  ;;  %223 = vmatpush.msra.mxu2 %v204_v40 }
  0x31   :  { %143 = vmatpush.msra.mxu0 %v112_v24  ;;  %263 = vmatpush.msra.mxu3 %v250_v58 }
  0x32   :  { %186 = vmatpush.msra.mxu1 %v155_v30  ;;  %224 = vmatpush.msra.mxu2 %v203_v41 }
  0x33   :  { %144 = vmatpush.msra.mxu0 %v111_v26  ;;  %264 = vmatpush.msra.mxu3 %v249_v59 }
  0x34   :  { %187 = vmatpush.msra.mxu1 %v154_v31  ;;  %225 = vmatpush.msra.mxu2 %v202_v42 }
  0x35   :  { %145 = vmatpush.msra.mxu0 %v110_v28  ;;  %265 = vmatpush.msra.mxu3 %v248_v60 }
  0x36   :  { %146 = vmatmul.f32.vlgmr.msra.gmra.mxu0 %v109_v29  ;;  %188 = vmatpush.msra.mxu1 %v153_v32 }
  0x37   :  { %226 = vmatpush.msra.mxu2 %v201_v43  ;;  %266 = vmatpush.msra.mxu3 %v247_v61 }
  0x39   :  { %227 = vmatpush.msra.mxu2 %v200_v44  ;;  %267 = vmatpush.msra.mxu3 %v246_v62 }
  0x3b   :  { %228 = vmatpush.msra.mxu2 %v199_v45  ;;  %268 = vmatpush.msra.mxu3 %v245_v63 }
  0x3d   :  { %229 = vmatpush.msra.mxu2 %v198_v51  ;;  %269 = vmatpush.msra.mxu3 %v244_v0 }
  0x3f   :  { %230 = vmatpush.msra.mxu2 %v197_v52  ;;  %270 = vmatpush.msra.mxu3 %v243_v1 }
  0x41   :  { %231 = vmatpush.msra.mxu2 %v196_v53  ;;  %271 = vmatpush.msra.mxu3 %v242_v2 }
  0x43   :  { %272 = vmatpush.msra.mxu3 %v241_v8 }
  0x45   :  { %273 = vmatpush.msra.mxu3 %v240_v9 }
  0x47   :  { %274 = vmatpush.msra.mxu3 %v239_v10 }
  0xb3   :  { %v147_v47 = vpop.f32.mrf.mxu0 }
  0xb4   :  { %v148_v48 = vadd.f32 %v324_v46, %v147_v47 }
  0xb6   :  { %vm150_vm0 = vcmp.ge.f32.partialorder %v148_v48, 0.0  ;;  %v151_v49 = vmul.f32 0.9, %v148_v48 }
  0xb8   :  { %v152_v50 = vsel %vm150_vm0, %v148_v48, %v151_v49 }
  0xb9   :  { %189 = vmatmul.f32.vlgmr.msra.gmra.mxu1 %v152_v50 }
 0x136   :  { %v190_v4 = vpop.f32.mrf.mxu1 }
 0x137   :  { %v191_v5 = vadd.f32 %v325_v3, %v190_v4 }
 0x139   :  { %vm193_vm1 = vcmp.ge.f32.partialorder %v191_v5, 0.0  ;;  %v194_v6 = vmul.f32 0.9, %v191_v5 }
 0x13b   :  { %v195_v7 = vsel %vm193_vm1, %v191_v5, %v194_v6 }
 0x13c   :  { %232 = vmatmul.f32.vlgmr.msra.gmra.mxu2 %v195_v7 }
 0x1bf   :  { %v233_v12 = vpop.f32.mrf.mxu2 }
 0x1c0   :  { %v234_v13 = vadd.f32 %v326_v11, %v233_v12 }
 0x1c2   :  { %vm236_vm2 = vcmp.ge.f32.partialorder %v234_v13, 0.0  ;;  %v237_v14 = vmul.f32 0.9, %v234_v13 }
 0x1c4   :  { %v238_v15 = vsel %vm236_vm2, %v234_v13, %v237_v14 }
 0x1c5   :  { %275 = vmatmul.f32.vlgmr.msra.gmra.mxu3 %v238_v15 }
 0x248   :  { %v276_v19 = vpop.f32.mrf.mxu3 }
 0x249   :  { %v277_v20 = vadd.f32 %v327_v17, %v276_v19 }
 0x24b   :  { %v280_v21 = vmul.f32 0.9, %v277_v20  ;;  %vm279_vm3 = vcmp.ge.f32.partialorder %v277_v20, 0.0 }
 0x24d   :  { %v281_v22 = vsel %vm279_vm3, %v277_v20, %v280_v21 }
 0x24e   :  { %v285_v23 = vsel %vm284_vm4, %v281_v22, -1e+30 }
 0x24f   :  { %286 = vmax.xlane.f32.xlu0 %v285_v23 }
 0x2c2   :  { %v287_v24 = vpop.xlane.xlu0 %286 }
 0x2c3   :  { %v288_v25 = vsub.f32 %v285_v23, %v287_v24 }
 0x2c5   :  { %v289_v26 = vmul.f32 1.442695, %v288_v25 }
 0x2c7   :  { %328 = vpow2.f32 %v289_v26 }
 0x2cd   :  { %v329_v27 = vpop.eup %328 }
 0x2ce   :  { %291 = vadd.xlane.f32.xlu0 %v329_v27 }
 0x341   :  { %v292_v28 = vpop.xlane.xlu0 %291 }
 0x342   :  { %330 = vlog2.f32 %v292_v28 }
 0x348   :  { %v331_v29 = vpop.eup %330 }
 0x349   :  { %v294_v30 = vmul.f32 0.6931472, %v331_v29 }
 0x34b   :  { %v295_v31 = vsub.f32 %v288_v25, %v294_v30 }
 0x34d   :  { %296 = vst [vmem:[#allocation11] sm:$0xff] %v295_v31 }
 0x34e   :  { %307 = dma.vmem_to_hbm [thread:$0]  %s303_s8, 128, %s305_s18, [#allocation4]  }
 0x34f   :  { %482 = dma.done.wait [#allocation4], 128  }
 0x350   :  { %483 = vsyncadd [#allocation4], 4294967168 }
 0x351   :  { %312 = vsyncpa [#allocation3], 1 }
 0x352   :  { %313 = vsyncpa [#allocation6], 1 }
 0x353   :  { %314 = vsyncpa [#allocation9], 1 }
 0x354   :  { %315 = vsyncpa [#allocation4], 1 }

</bundles_post_ra>
